<compile_context>
chip_gen: v5e
topology: v5e:2x2
jax: 0.10.0
libtpu: 0.0.40
codegen_flags: <defaults>
</compile_context>

<pallas_src>
import functools

import jax
import jax.numpy as jnp
from jax.experimental import pallas as pl
from jax.experimental.pallas import tpu as pltpu


def _round_up(x, m):
    return (x + m - 1) // m * m


def _mlpdrop2_kernel(x_ref, w1_ref, b1_ref, w2_ref, b2_ref, *rest,
                     drop_p, apply_dropout, use_hw_prng, precision):
    rest = list(rest)
    seed_ref = bits_ref = None
    if apply_dropout:
        if use_hw_prng:
            seed_ref = rest.pop(0)     # (1,) int32 scalar in SMEM
        else:
            bits_ref = rest.pop(0)     # (tile_b, H) uint8 fallback bits
    y_ref, h1_ref, relu_ref = rest

    # fc: h1 = x @ W1 + b1   (outs['h1'])
    h1 = jnp.dot(x_ref[...], w1_ref[...],
                 preferred_element_type=jnp.float32, precision=precision) + b1_ref[...]
    h1_ref[...] = h1.astype(h1_ref.dtype)

    # Dropout + LeakyReLU(0.2) fused into a single select chain.  Exact because leaky_relu is
    # positively homogeneous and scale = 1/(1-p) > 0:
    #   leaky_relu(dropout(h)) == where(keep, scale * leaky_relu(h), 0)
    lrelu = jnp.where(h1 >= 0.0, h1, 0.2 * h1)
    if apply_dropout:
        scale = 1.0 / (1.0 - drop_p)                      # trace-time Python constant
        if use_hw_prng:
            # Per-tile independent stream: mix the user seed with the grid position.
            pltpu.prng_seed(seed_ref[0], pl.program_id(0))
            rnd = pltpu.bitcast(pltpu.prng_random_bits(h1.shape), jnp.uint32)
            thr = jnp.uint32(min(int(round(drop_p * 2.0 ** 32)), 2 ** 32 - 1))
            keep = rnd >= thr                             # P(keep) = 1 - p
        else:
            thr = jnp.int32(min(int(round(drop_p * 256.0)), 255))
            keep = bits_ref[...].astype(jnp.int32) >= thr  # P(keep) ~= 1 - p (1/256 resolution)
        act = jnp.where(keep, lrelu * scale, 0.0)
    else:
        act = lrelu
    relu_ref[...] = act.astype(relu_ref.dtype)

    # fc2: y = act @ W2 + b2  (y from the full f32 activation, not the bf16 stored copy)
    y = jnp.dot(act, w2_ref[...],
                preferred_element_type=jnp.float32, precision=precision) + b2_ref[...]
    y_ref[...] = y.astype(y_ref.dtype)


def mlpdrop2_forward(x, params, *, drop_p=0.2, training=True, rng_key=None,
                     tile_b=512, aux_dtype=jnp.bfloat16, use_hw_prng=None,
                     matmul_precision=jax.lax.Precision.HIGHEST):
    """x: (B, n_input) f32.  params: w1 (n_in, H), b1 (1, H), w2 (H, n_out), b2 (1, n_out).

    Returns (y, outs) mirroring MLPDrop2.forward.  Side outputs are stored in `aux_dtype`
    (default bf16 to halve HBM write traffic; pass jnp.float32 for exact parity).
    On v5e with large H/n_out, pass matmul_precision=jax.lax.Precision.DEFAULT to avoid the
    multi-pass f32 MXU cost (irrelevant at tiny feature dims).
    """
    assert 0.0 <= drop_p < 1.0
    if use_hw_prng is None:
        # In-kernel PRNG needs the Mosaic TPU lowering; fall back to an external uint8 bits
        # tensor on CPU / interpret-mode backends.
        use_hw_prng = jax.default_backend() == "tpu"

    B, n_in = x.shape
    H = params["w1"].shape[1]
    n_out = params["w2"].shape[1]
    apply_dropout = bool(training) and drop_p > 0.0

    # Batch tiling: big tiles (amortize ~0.35 us/grid-step), but aim for >= 2 grid steps so the
    # "parallel" batch axis actually splits across v7x's two TensorCores for moderate B.
    half_b = _round_up(max(1, (B + 1) // 2), 8)
    tile_b = max(8, min(tile_b, half_b))
    B_pad = _round_up(B, tile_b)
    grid_b = B_pad // tile_b

    f32 = jnp.float32
    x_f = x.astype(f32)
    if B_pad != B:
        x_in = jnp.zeros((B_pad, n_in), f32).at[:B].set(x_f)
    else:
        x_in = x_f
    w1 = jnp.asarray(params["w1"], f32)
    b1 = jnp.asarray(params["b1"], f32)
    w2 = jnp.asarray(params["w2"], f32)
    b2 = jnp.asarray(params["b2"], f32)

    # Feature dims stay unpadded: a block last-dim equal to the full array dim is legal; masked
    # stores cost vst-slot slack, padding costs real HBM bandwidth.
    in_specs = [
        pl.BlockSpec((tile_b, n_in), lambda i: (i, 0)),   # x: tiled over batch
        pl.BlockSpec((n_in, H), lambda i: (0, 0)),        # W1: resident in VMEM
        pl.BlockSpec((1, H), lambda i: (0, 0)),           # b1: resident
        pl.BlockSpec((H, n_out), lambda i: (0, 0)),       # W2: resident
        pl.BlockSpec((1, n_out), lambda i: (0, 0)),       # b2: resident
    ]
    inputs = [x_in, w1, b1, w2, b2]

    if apply_dropout:
        if rng_key is None:
            rng_key = jax.random.PRNGKey(0)
        if use_hw_prng:
            seed = jax.random.randint(rng_key, (1,), 0, jnp.iinfo(jnp.int32).max,
                                      dtype=jnp.int32)
            in_specs.append(pl.BlockSpec(memory_space=pltpu.MemorySpace.SMEM))
            inputs.append(seed)
        else:
            # Portable fallback: uint8 bits (4x less traffic than u32); independent per row.
            bits = jax.random.bits(rng_key, (B_pad, H), dtype=jnp.uint8)
            in_specs.append(pl.BlockSpec((tile_b, H), lambda i: (i, 0)))
            inputs.append(bits)

    out_specs = (
        pl.BlockSpec((tile_b, n_out), lambda i: (i, 0)),  # y
        pl.BlockSpec((tile_b, H), lambda i: (i, 0)),      # h1
        pl.BlockSpec((tile_b, H), lambda i: (i, 0)),      # relu_h1 (== drop_h1 after inplace relu)
    )
    out_shape = (
        jax.ShapeDtypeStruct((B_pad, n_out), f32),
        jax.ShapeDtypeStruct((B_pad, H), aux_dtype),
        jax.ShapeDtypeStruct((B_pad, H), aux_dtype),
    )

    kernel = functools.partial(
        _mlpdrop2_kernel, drop_p=float(drop_p), apply_dropout=apply_dropout,
        use_hw_prng=use_hw_prng, precision=matmul_precision)

    aux_bytes = jnp.dtype(aux_dtype).itemsize
    flops = 2 * B_pad * (n_in * H + H * n_out)
    bytes_accessed = (4 * (x_in.size + w1.size + b1.size + w2.size + b2.size + B_pad * n_out)
                      + 2 * aux_bytes * B_pad * H
                      + (B_pad * H if (apply_dropout and not use_hw_prng) else 0))

    y_p, h1_p, relu_p = pl.pallas_call(
        kernel,
        out_shape=out_shape,
        grid=(grid_b,),
        in_specs=in_specs,
        out_specs=out_specs,
        compiler_params=pltpu.CompilerParams(
            dimension_semantics=("parallel",),          # megacore sharding on v7x
            vmem_limit_bytes=32 * 1024 * 1024,          # explicit (v5e scoped default is 16 MiB)
        ),
        cost_estimate=pl.CostEstimate(
            flops=flops, transcendentals=0, bytes_accessed=int(bytes_accessed)),
    )(*inputs)

    if B_pad != B:
        y_p, h1_p, relu_p = y_p[:B], h1_p[:B], relu_p[:B]
    y = y_p[:, :n_out]
    h1 = h1_p[:, :H]
    relu_h1 = relu_p[:, :H]

    # torch aliasing: inplace leaky_relu mutates the dropout output, so drop_h1 == relu_h1 in
    # training; in eval mode dropout returns the SAME tensor, so h1 is mutated too.
    if apply_dropout:
        outs = {"h1": h1, "drop_h1": relu_h1, "relu_h1": relu_h1}
    else:
        outs = {"h1": relu_h1, "drop_h1": relu_h1, "relu_h1": relu_h1}
    return y, outs


def init_params(key, n_input, n_hidden, n_output):
    """Mirror torch.nn.Linear's U(-1/sqrt(fan_in), 1/sqrt(fan_in)); weights stored as (in, out)."""
    ks = jax.random.split(key, 4)

    def linear(kw, kb, fan_in, fan_out):
        bound = 1.0 / float(fan_in) ** 0.5
        w = jax.random.uniform(kw, (fan_in, fan_out), jnp.float32, -bound, bound)
        b = jax.random.uniform(kb, (1, fan_out), jnp.float32, -bound, bound)
        return w, b

    w1, b1 = linear(ks[0], ks[1], n_input, n_hidden)
    w2, b2 = linear(ks[2], ks[3], n_hidden, n_output)
    return {"w1": w1, "b1": b1, "w2": w2, "b2": b2}


if __name__ == "__main__":
    key = jax.random.PRNGKey(0)
    k_x, k_p, k_drop = jax.random.split(key, 3)

    B, n_input, n_hidden, n_output, drop_p = 8, 32, 64, 16, 0.2
    x = jax.random.normal(k_x, (B, n_input), jnp.float32)
    params = init_params(k_p, n_input, n_hidden, n_output)

    # Pure-JAX references (do NOT shadow any kernel helpers).
    hi = jax.lax.Precision.HIGHEST
    h1_expect = jnp.dot(x, params["w1"], precision=hi) + params["b1"]
    lrelu_expect = jnp.where(h1_expect >= 0, h1_expect, 0.2 * h1_expect)
    scale = 1.0 / (1.0 - drop_p)

    # ---- training mode (dropout active) ----
    y_tr, outs_tr = mlpdrop2_forward(x, params, drop_p=drop_p, training=True, rng_key=k_drop)
    y_tr, outs_tr = jax.block_until_ready((y_tr, outs_tr))
    assert y_tr.shape == (B, n_output)
    assert outs_tr["h1"].shape == (B, n_hidden)
    assert outs_tr["relu_h1"].shape == (B, n_hidden)

    h1_got = outs_tr["h1"].astype(jnp.float32)
    assert jnp.allclose(h1_got, h1_expect, atol=3e-2, rtol=3e-2)     # bf16 side output

    relu_got = outs_tr["relu_h1"].astype(jnp.float32)
    kept = relu_got != 0.0                                           # dropped units are exactly 0
    kept_frac = jnp.mean(kept.astype(jnp.float32))
    assert 0.55 < float(kept_frac) < 0.95                            # ~1-p of units survive
    assert jnp.allclose(jnp.where(kept, relu_got, 0.0),
                        jnp.where(kept, lrelu_expect * scale, 0.0), atol=3e-2, rtol=3e-2)

    act_expect = jnp.where(kept, lrelu_expect * scale, 0.0)          # reconstruct kernel activation
    y_expect_tr = jnp.dot(act_expect, params["w2"], precision=hi) + params["b2"]
    assert jnp.allclose(y_tr, y_expect_tr, atol=2e-3, rtol=2e-3)

    # ---- eval mode (dropout = identity) ----
    y_ev, outs_ev = mlpdrop2_forward(x, params, drop_p=drop_p, training=False)
    y_ev = jax.block_until_ready(y_ev)
    y_expect_ev = jnp.dot(lrelu_expect, params["w2"], precision=hi) + params["b2"]
    assert jnp.allclose(y_ev, y_expect_ev, atol=2e-3, rtol=2e-3)
    assert jnp.allclose(outs_ev["relu_h1"].astype(jnp.float32), lrelu_expect,
                        atol=3e-2, rtol=3e-2)

    print("KERNEL_OK")
</pallas_src>

<mosaic_0001>
module attributes {stable_mosaic.version = 11 : i64} {
  func.func @_mlpdrop2_kernel(%arg0: i32, %arg1: memref<8x32xf32, #tpu.memory_space<vmem>>, %arg2: memref<32x64xf32, #tpu.memory_space<vmem>>, %arg3: memref<1x64xf32, #tpu.memory_space<vmem>>, %arg4: memref<64x16xf32, #tpu.memory_space<vmem>>, %arg5: memref<1x16xf32, #tpu.memory_space<vmem>>, %arg6: memref<8x64xi8, #tpu.memory_space<vmem>>, %arg7: memref<8x16xf32, #tpu.memory_space<vmem>>, %arg8: memref<8x64xbf16, #tpu.memory_space<vmem>>, %arg9: memref<8x64xbf16, #tpu.memory_space<vmem>>) attributes {dimension_semantics = [#tpu.dimension_semantics<parallel>], iteration_bounds = array<i64: 1>, scalar_prefetch = 0 : i64, scratch_operands = 0 : i64, tpu.core_type = #tpu.core_type<tc>, window_params = [{transform_indices = @transform_0, window_bounds = array<i64: 8, 32>}, {pipeline_mode = #tpu.pipeline_mode<synchronous>, transform_indices = @transform_1, window_bounds = array<i64: 32, 64>}, {pipeline_mode = #tpu.pipeline_mode<synchronous>, transform_indices = @transform_2, window_bounds = array<i64: 1, 64>}, {pipeline_mode = #tpu.pipeline_mode<synchronous>, transform_indices = @transform_3, window_bounds = array<i64: 64, 16>}, {pipeline_mode = #tpu.pipeline_mode<synchronous>, transform_indices = @transform_4, window_bounds = array<i64: 1, 16>}, {transform_indices = @transform_5, window_bounds = array<i64: 8, 64>}, {transform_indices = @transform_6, window_bounds = array<i64: 8, 16>}, {transform_indices = @transform_7, window_bounds = array<i64: 8, 64>}, {transform_indices = @transform_8, window_bounds = array<i64: 8, 64>}]} {
    %c0 = arith.constant 0 : index
    %c0_0 = arith.constant 0 : index
    %0 = vector.load %arg1[%c0, %c0_0] : memref<8x32xf32, #tpu.memory_space<vmem>>, vector<8x32xf32>
    %c0_1 = arith.constant 0 : index
    %c0_2 = arith.constant 0 : index
    %1 = vector.load %arg2[%c0_1, %c0_2] : memref<32x64xf32, #tpu.memory_space<vmem>>, vector<32x64xf32>
    %cst = arith.constant dense<0.000000e+00> : vector<8x64xf32>
    %2 = tpu.matmul %0, %1, %cst {dimension_numbers = #tpu.dot_dimension_numbers<[1], [0], [0], [1], [0, 0, 1, 1], [], []>, precision = #tpu.contract_precision<fp32>} : vector<8x32xf32>, vector<32x64xf32>, vector<8x64xf32> -> vector<8x64xf32>
    %c0_3 = arith.constant 0 : index
    %c0_4 = arith.constant 0 : index
    %3 = vector.load %arg3[%c0_3, %c0_4] : memref<1x64xf32, #tpu.memory_space<vmem>>, vector<1x64xf32>
    %4 = vector.broadcast %3 : vector<1x64xf32> to vector<8x64xf32>
    %5 = arith.addf %2, %4 : vector<8x64xf32>
    %6 = arith.truncf %5 : vector<8x64xf32> to vector<8x64xbf16>
    %c0_5 = arith.constant 0 : index
    %c0_6 = arith.constant 0 : index
    %7 = vector.load %arg8[%c0_5, %c0_6] : memref<8x64xbf16, #tpu.memory_space<vmem>>, vector<8x64xbf16>
    tpu.vector_store %arg8[%c0_5, %c0_6], %6 {strides = array<i32>} : memref<8x64xbf16, #tpu.memory_space<vmem>>, vector<8x64xbf16>,
    %cst_7 = arith.constant 0.000000e+00 : f32
    %8 = vector.broadcast %cst_7 : f32 to vector<8x64xf32>
    %9 = arith.cmpf oge, %5, %8 : vector<8x64xf32>
    %cst_8 = arith.constant 2.000000e-01 : f32
    %10 = vector.broadcast %cst_8 : f32 to vector<8x64xf32>
    %11 = arith.mulf %10, %5 : vector<8x64xf32>
    %12 = arith.select %9, %5, %11 : vector<8x64xi1>, vector<8x64xf32>
    %c0_9 = arith.constant 0 : index
    %c0_10 = arith.constant 0 : index
    %13 = vector.load %arg6[%c0_9, %c0_10] : memref<8x64xi8, #tpu.memory_space<vmem>>, vector<8x64xi8>
    %14 = arith.extui %13 : vector<8x64xi8> to vector<8x64xi32>
    %c51_i32 = arith.constant 51 : i32
    %15 = vector.broadcast %c51_i32 : i32 to vector<8x64xi32>
    %16 = arith.cmpi sge, %14, %15 : vector<8x64xi32>
    %cst_11 = arith.constant 1.250000e+00 : f32
    %17 = vector.broadcast %cst_11 : f32 to vector<8x64xf32>
    %18 = arith.mulf %12, %17 : vector<8x64xf32>
    %cst_12 = arith.constant 0.000000e+00 : f32
    %19 = vector.broadcast %cst_12 : f32 to vector<8x64xf32>
    %20 = arith.select %16, %18, %19 : vector<8x64xi1>, vector<8x64xf32>
    %21 = arith.truncf %20 : vector<8x64xf32> to vector<8x64xbf16>
    %c0_13 = arith.constant 0 : index
    %c0_14 = arith.constant 0 : index
    %22 = vector.load %arg9[%c0_13, %c0_14] : memref<8x64xbf16, #tpu.memory_space<vmem>>, vector<8x64xbf16>
    tpu.vector_store %arg9[%c0_13, %c0_14], %21 {strides = array<i32>} : memref<8x64xbf16, #tpu.memory_space<vmem>>, vector<8x64xbf16>,
    %c0_15 = arith.constant 0 : index
    %c0_16 = arith.constant 0 : index
    %23 = vector.load %arg4[%c0_15, %c0_16] : memref<64x16xf32, #tpu.memory_space<vmem>>, vector<64x16xf32>
    %cst_17 = arith.constant dense<0.000000e+00> : vector<8x16xf32>
    %24 = tpu.matmul %20, %23, %cst_17 {dimension_numbers = #tpu.dot_dimension_numbers<[1], [0], [0], [1], [0, 0, 1, 1], [], []>, precision = #tpu.contract_precision<fp32>} : vector<8x64xf32>, vector<64x16xf32>, vector<8x16xf32> -> vector<8x16xf32>
    %c0_18 = arith.constant 0 : index
    %c0_19 = arith.constant 0 : index
    %25 = vector.load %arg5[%c0_18, %c0_19] : memref<1x16xf32, #tpu.memory_space<vmem>>, vector<1x16xf32>
    %26 = vector.broadcast %25 : vector<1x16xf32> to vector<8x16xf32>
    %27 = arith.addf %24, %26 : vector<8x16xf32>
    %c0_20 = arith.constant 0 : index
    %c0_21 = arith.constant 0 : index
    %28 = vector.load %arg7[%c0_20, %c0_21] : memref<8x16xf32, #tpu.memory_space<vmem>>, vector<8x16xf32>
    tpu.vector_store %arg7[%c0_20, %c0_21], %27 {strides = array<i32>} : memref<8x16xf32, #tpu.memory_space<vmem>>, vector<8x16xf32>,
    return
  }
  func.func @transform_0(%arg0: i32) -> (i32, i32) {
    %c0_i32 = arith.constant 0 : i32
    %c0_i32_0 = arith.constant 0 : i32
    return %arg0, %c0_i32 : i32, i32
  }
  func.func @transform_1(%arg0: i32) -> (i32, i32) {
    %c0_i32 = arith.constant 0 : i32
    %c0_i32_0 = arith.constant 0 : i32
    %c0_i32_1 = arith.constant 0 : i32
    return %c0_i32, %c0_i32_0 : i32, i32
  }
  func.func @transform_2(%arg0: i32) -> (i32, i32) {
    %c0_i32 = arith.constant 0 : i32
    %c0_i32_0 = arith.constant 0 : i32
    %c0_i32_1 = arith.constant 0 : i32
    return %c0_i32, %c0_i32_0 : i32, i32
  }
  func.func @transform_3(%arg0: i32) -> (i32, i32) {
    %c0_i32 = arith.constant 0 : i32
    %c0_i32_0 = arith.constant 0 : i32
    %c0_i32_1 = arith.constant 0 : i32
    return %c0_i32, %c0_i32_0 : i32, i32
  }
  func.func @transform_4(%arg0: i32) -> (i32, i32) {
    %c0_i32 = arith.constant 0 : i32
    %c0_i32_0 = arith.constant 0 : i32
    %c0_i32_1 = arith.constant 0 : i32
    return %c0_i32, %c0_i32_0 : i32, i32
  }
  func.func @transform_5(%arg0: i32) -> (i32, i32) {
    %c0_i32 = arith.constant 0 : i32
    %c0_i32_0 = arith.constant 0 : i32
    return %arg0, %c0_i32 : i32, i32
  }
  func.func @transform_6(%arg0: i32) -> (i32, i32) {
    %c0_i32 = arith.constant 0 : i32
    %c0_i32_0 = arith.constant 0 : i32
    return %arg0, %c0_i32 : i32, i32
  }
  func.func @transform_7(%arg0: i32) -> (i32, i32) {
    %c0_i32 = arith.constant 0 : i32
    %c0_i32_0 = arith.constant 0 : i32
    return %arg0, %c0_i32 : i32, i32
  }
  func.func @transform_8(%arg0: i32) -> (i32, i32) {
    %c0_i32 = arith.constant 0 : i32
    %c0_i32_0 = arith.constant 0 : i32
    return %arg0, %c0_i32 : i32, i32
  }
}

</mosaic_0001>

<bundles_post_ra>
// kernel: tpu_custom_call.1
= control target key start
LH: loop header
LB: loop body
LE: loop exit
PB: predicated region body
PF: predicated region fallthrough
CT: control target
= control target key end

     0   :  { %14 = vsyncpa [#allocation3], 0  ;;  %vm37_vm0 = vcmask 261120   ;;  %s767_s0 = inlined_call_operand.vmem [shape: f32[8,32], index: 0, kind: input, shape index: {}]   ;;  %s768_s1 = inlined_call_operand.vmem [shape: f32[32,64], index: 1, kind: input, shape index: {}]   ;;  %s769_s2 = inlined_call_operand.vmem [shape: f32[1,64], index: 2, kind: input, shape index: {}]   ;;  %s770_s3 = inlined_call_operand.vmem [shape: f32[64,16], index: 3, kind: input, shape index: {}]   ;;  %s771_s4 = inlined_call_operand.vmem [shape: f32[1,16], index: 4, kind: input, shape index: {}]   ;;  %s772_s5 = inlined_call_operand.vmem [shape: u8[8,64], index: 5, kind: input, shape index: {}]   ;;  %s773_s6 = inlined_call_operand.hbm [shape: f32[8,16], index: 6, kind: output, shape index: {0}]   ;;  %s774_s7 = inlined_call_operand.hbm [shape: bf16[8,64], index: 7, kind: output, shape index: {1}]   ;;  %s775_s8 = inlined_call_operand.hbm [shape: bf16[8,64], index: 8, kind: output, shape index: {2}]  }
   0x1   :  { %v32_v0 = vld [vmem:[%s768_s1 + $0x18] sm:$0xff]  ;;  %v31_v1 = vld [vmem:[%s768_s1 + $0x10] sm:$0xff]  ;;  %v30_v2 = vld [vmem:[%s768_s1 + $0x8] sm:$0xff] }
   0x2   :  { %v53_v3 = vand.u32 4294901760, %v32_v0  ;;  %v55_v4 = vand.u32 4294901760, %v31_v1  ;;  %v57_v5 = vand.u32 4294901760, %v30_v2  ;;  %v29_v6 = vld [vmem:[%s768_s1] sm:$0xff] }
   0x3   :  { %v28_v7 = vld [vmem:[%s767_s0] sm:$0xff]  ;;  %v59_v8 = vand.u32 4294901760, %v29_v6 }
   0x4   :  { %v39_v9 = vsel %vm37_vm0, %v28_v7, 0  ;;  %v83_v10 = vsub.f32 %v32_v0, %v53_v3  ;;  %54 = vmatpush.msra.mxu0 %v53_v3  ;;  %v89_v11 = vsub.f32 %v31_v1, %v55_v4  ;;  %154 = vmatpush.msra.mxu3 %v53_v3  ;;  %v95_v12 = vsub.f32 %v30_v2, %v57_v5 }
   0x5   :  { %v61_v13 = vand.u32 4294901760, %v39_v9 }
   0x6   :  { %15 = vsyncpa [#allocation5], 0  ;;  %v101_v14 = vsub.f32 %v29_v6, %v59_v8  ;;  %125 = vmatpush.msra.mxu2 %v83_v10  ;;  %56 = vmatpush.msra.mxu0 %v55_v4  ;;  %v84_v15 = vand.u32 4294901760, %v83_v10  ;;  %v90_v16 = vand.u32 4294901760, %v89_v11  ;;  %v96_v18 = vand.u32 4294901760, %v95_v12  ;;  %v247_v31 = vld [vmem:[%s770_s3 + $0x38] sm:$0xff] }
   0x7   :  { %v62_v17 = vsub.f32 %v39_v9, %v61_v13  ;;  %156 = vmatpush.msra.mxu3 %v55_v4  ;;  %v689_v32 = vand.u32 4294901760, %v247_v31  ;;  %v246_v33 = vld [vmem:[%s770_s3 + $0x30] sm:$0xff]  ;;  %v245_v36 = vld [vmem:[%s770_s3 + $0x28] sm:$0xff]  ;;  %v244_v40 = vld [vmem:[%s770_s3 + $0x20] sm:$0xff]  ;;  %vm227_vm1 = vcmask 519168   ;;  %vm252_vm4 = vcmask 523264  }
   0x8   :  { %v102_v19 = vand.u32 4294901760, %v101_v14  ;;  %128 = vmatpush.msra.mxu2 %v89_v11  ;;  %v85_v20 = vsub.f32 %v83_v10, %v84_v15  ;;  %58 = vmatpush.msra.mxu0 %v57_v5  ;;  %v91_v21 = vsub.f32 %v89_v11, %v90_v16  ;;  %v97_v22 = vsub.f32 %v95_v12, %v96_v18  ;;  %v243_v45 = vld [vmem:[%s770_s3 + $0x18] sm:$0xff]  ;;  %v242_v51 = vld [vmem:[%s770_s3 + $0x10] sm:$0xff]  ;;  %v241_v57 = vld [vmem:[%s770_s3 + $0x8] sm:$0xff]  ;;  %s513_s12 = sshll.u32 %s774_s7, 4  ;;  %s624_s13 = smov [#allocation6]   ;;  %s514_s12 = int_to_ptr.hbm [resolvable:$true] %s513_s12 }
   0x9   :  { %v63_v23 = vand.u32 4294901760, %v62_v17  ;;  %158 = vmatpush.msra.mxu3 %v57_v5  ;;  %v695_v34 = vsub.f32 %v247_v31, %v689_v32  ;;  %v697_v35 = vand.u32 4294901760, %v246_v33  ;;  %v708_v39 = vand.u32 4294901760, %v245_v36  ;;  %v240_v63 = vld [vmem:[%s770_s3] sm:$0xff]  ;;  %s522_s14 = sshll.u32 %s624_s13, 4  ;;  %s524_s15 = sshll.u32 %s775_s8, 4  ;;  %s523_s14 = int_to_ptr.vmem [resolvable:$true] %s522_s14  ;;  %s525_s15 = int_to_ptr.hbm [resolvable:$true] %s524_s15 }
   0xa   :  { %v86_v24 = vand.u32 4294901760, %v85_v20  ;;  %131 = vmatpush.msra.mxu2 %v95_v12  ;;  %v92_v25 = vand.u32 4294901760, %v91_v21  ;;  %60 = vmatpush.msra.mxu0 %v59_v8  ;;  %v103_v27 = vsub.f32 %v101_v14, %v102_v19  ;;  %v98_v28 = vand.u32 4294901760, %v97_v22  ;;  %v232_v22 = vld [vmem:[%s772_s5] sm:$0x3]  ;;  %s625_s7 = smov [#allocation2]  }
   0xb   :  { %v64_v26 = vsub.f32 %v62_v17, %v63_v23  ;;  %160 = vmatpush.msra.mxu3 %v59_v8  ;;  %v299_v37 = vand.u32 4294901760, %v695_v34  ;;  %v706_v38 = vsub.f32 %v246_v33, %v697_v35  ;;  %v719_v43 = vsub.f32 %v245_v36, %v708_v39  ;;  %s500_s18 = sshll.u32 %s625_s7, 4  ;;  %s502_s20 = sshll.u32 %s773_s6, 4  ;;  %s501_s18 = int_to_ptr.vmem [resolvable:$true] %s500_s18  ;;  %s503_s20 = int_to_ptr.hbm [resolvable:$true] %s502_s20 }
   0xc   :  { %183 = vmatpush.msrb.mxu0 %v84_v15  ;;  %87 = vmatpush.msra.mxu1 %v86_v24  ;;  %v104_v30 = vand.u32 4294901760, %v103_v27  ;;  %v721_v44 = vand.u32 4294901760, %v244_v40  ;;  %v272_v50 = vand.u32 4294901760, %v243_v45  ;;  %v274_v55 = vand.u32 4294901760, %v242_v51  ;;  %v545_v15 = vld [vmem:[%s769_s2] ss:$0 sm:$0xff] }
   0xd   :  { %134 = vmatpush.msra.mxu2 %v101_v14  ;;  %v65_v29 = vand.u32 4294901760, %v64_v26  ;;  %164 = vmatmul.f32.vlgmr.msra.gmra.mxu3 %v63_v23  ;;  %v300_v41 = vsub.f32 %v695_v34, %v299_v37  ;;  %v305_v42 = vand.u32 4294901760, %v706_v38  ;;  %v311_v48 = vand.u32 4294901760, %v719_v43  ;;  %s623_s2 = smov [#allocation4]  }
   0xe   :  { %137 = vmatmul.f32.vlgmr.msra.gmra.mxu2 %v62_v17  ;;  %93 = vmatpush.msra.mxu1 %v92_v25  ;;  %v316_v49 = vsub.f32 %v244_v40, %v721_v44  ;;  %v322_v56 = vsub.f32 %v243_v45, %v272_v50  ;;  %v328_v60 = vsub.f32 %v242_v51, %v274_v55  ;;  %v276_v61 = vand.u32 4294901760, %v241_v57  ;;  %s511_s5 = sshll.u32 %s623_s2, 4  ;;  %s512_s5 = int_to_ptr.vmem [resolvable:$true] %s511_s5 }
   0xf   :  { %66 = vmatmul.f32.vlgmr.msra.gmra.mxu0 %v65_v29  ;;  %265 = vmatpush.msrb.mxu2 %v689_v32  ;;  %v301_v46 = vand.u32 4294901760, %v300_v41  ;;  %v306_v47 = vsub.f32 %v706_v38, %v305_v42  ;;  %v312_v53 = vsub.f32 %v719_v43, %v311_v48  ;;  %v233_v26 = vunpack.c.0.s8 %v232_v22 }
  0x10   :  { %187 = vmatpush.msrb.mxu0 %v90_v16  ;;  %99 = vmatpush.msra.mxu1 %v98_v28  ;;  %v317_v54 = vand.u32 4294901760, %v316_v49  ;;  %v323_v62 = vand.u32 4294901760, %v322_v56  ;;  %v329_v1 = vand.u32 4294901760, %v328_v60  ;;  %v334_v2 = vsub.f32 %v241_v57, %v276_v61 }
  0x11   :  { %267 = vmatpush.msrb.mxu2 %v697_v35  ;;  %302 = vmatpush.msrb.mxu3 %v301_v46  ;;  %v307_v52 = vand.u32 4294901760, %v306_v47  ;;  %v313_v58 = vand.u32 4294901760, %v312_v53  ;;  %vm493_vm5 = vcmask 130048  }
  0x12   :  { %191 = vmatpush.msrb.mxu0 %v96_v18  ;;  %105 = vmatpush.msra.mxu1 %v104_v30  ;;  %v318_v59 = vsub.f32 %v316_v49, %v317_v54  ;;  %v335_v6 = vand.u32 4294901760, %v334_v2  ;;  %v234_v30 = vand.u32 255, %v233_v26 }
  0x13   :  { %107 = vmatmul.f32.vlgmr.msra.gmra.mxu1 %v61_v13  ;;  %269 = vmatpush.msrb.mxu2 %v708_v39 }
  0x14   :  { %195 = vmatpush.msrb.mxu0 %v102_v19  ;;  %214 = vmatpush.msrb.mxu1 %v53_v3  ;;  %v319_v0 = vand.u32 4294901760, %v318_v59  ;;  %v278_v3 = vand.u32 4294901760, %v240_v63  ;;  %v336_v10 = vsub.f32 %v334_v2, %v335_v6  ;;  %vm235_vm3 = vcmp.ge.s32.totalorder %v234_v30, 51 }
  0x15   :  { %271 = vmatpush.msrb.mxu2 %v721_v44  ;;  %308 = vmatpush.msrb.mxu3 %v307_v52 }
  0x16   :  { %216 = vmatpush.msrb.mxu1 %v55_v4  ;;  %360 = vmatpush.msra.mxu0 %v695_v34  ;;  %v324_v4 = vsub.f32 %v322_v56, %v323_v62  ;;  %v340_v7 = vsub.f32 %v240_v63, %v278_v3  ;;  %v337_v12 = vand.u32 4294901760, %v336_v10 }
  0x17   :  { %197 = vmatmul.f32.vlgmr.msrb.gmra.mxu0 %v61_v13  ;;  %273 = vmatpush.msrb.mxu2 %v272_v50 }
  0x18   :  { %218 = vmatpush.msrb.mxu1 %v57_v5  ;;  %363 = vmatpush.msra.mxu0 %v706_v38  ;;  %v330_v5 = vsub.f32 %v328_v60, %v329_v1  ;;  %v341_v11 = vand.u32 4294901760, %v340_v7 }
  0x19   :  { %275 = vmatpush.msrb.mxu2 %v274_v55  ;;  %314 = vmatpush.msrb.mxu3 %v313_v58 }
  0x1a   :  { %220 = vmatpush.msrb.mxu1 %v59_v8  ;;  %366 = vmatpush.msra.mxu0 %v719_v43  ;;  %v325_v8 = vand.u32 4294901760, %v324_v4  ;;  %v331_v9 = vand.u32 4294901760, %v330_v5  ;;  %v546_v43 = vld [vmem:[%s771_s4] ss:$0 sm:$0xff] }
  0x1b   :  { %222 = vmatmul.f32.vlgmr.msrb.gmra.mxu1 %v61_v13  ;;  %277 = vmatpush.msrb.mxu2 %v276_v61  ;;  %v342_v13 = vsub.f32 %v340_v7, %v341_v11 }
  0x1c   :  { %397 = vmatpush.msra.mxu1 %v689_v32  ;;  %369 = vmatpush.msra.mxu0 %v316_v49 }
  0x1d   :  { %320 = vmatpush.msrb.mxu3 %v319_v0  ;;  %279 = vmatpush.msrb.mxu2 %v278_v3  ;;  %v343_v14 = vand.u32 4294901760, %v342_v13 }
  0x1e   :  { %399 = vmatpush.msra.mxu1 %v697_v35  ;;  %372 = vmatpush.msra.mxu0 %v322_v56 }
  0x1f   :  { %430 = vmatpush.msra.mxu2 %v299_v37  ;;  %326 = vmatpush.msrb.mxu3 %v325_v8 }
  0x20   :  { %401 = vmatpush.msra.mxu1 %v708_v39  ;;  %375 = vmatpush.msra.mxu0 %v328_v60 }
  0x21   :  { %434 = vmatpush.msra.mxu2 %v305_v42  ;;  %332 = vmatpush.msrb.mxu3 %v331_v9 }
  0x22   :  { %403 = vmatpush.msra.mxu1 %v721_v44  ;;  %378 = vmatpush.msra.mxu0 %v334_v2 }
  0x23   :  { %438 = vmatpush.msra.mxu2 %v311_v48  ;;  %338 = vmatpush.msrb.mxu3 %v337_v12 }
  0x24   :  { %405 = vmatpush.msra.mxu1 %v272_v50  ;;  %381 = vmatpush.msra.mxu0 %v340_v7 }
  0x25   :  { %442 = vmatpush.msra.mxu2 %v317_v54  ;;  %344 = vmatpush.msrb.mxu3 %v343_v14 }
  0x26   :  { %407 = vmatpush.msra.mxu1 %v274_v55 }
  0x27   :  { %473 = vmatpush.msra.mxu3 %v689_v32  ;;  %446 = vmatpush.msra.mxu2 %v323_v62 }
  0x28   :  { %409 = vmatpush.msra.mxu1 %v276_v61 }
  0x29   :  { %475 = vmatpush.msra.mxu3 %v697_v35  ;;  %450 = vmatpush.msra.mxu2 %v329_v1 }
  0x2a   :  { %411 = vmatpush.msra.mxu1 %v278_v3 }
  0x2b   :  { %477 = vmatpush.msra.mxu3 %v708_v39  ;;  %454 = vmatpush.msra.mxu2 %v335_v6 }
  0x2d   :  { %479 = vmatpush.msra.mxu3 %v721_v44  ;;  %458 = vmatpush.msra.mxu2 %v341_v11 }
  0x2f   :  { %481 = vmatpush.msra.mxu3 %v272_v50 }
  0x31   :  { %483 = vmatpush.msra.mxu3 %v274_v55 }
  0x33   :  { %485 = vmatpush.msra.mxu3 %v276_v61 }
  0x35   :  { %487 = vmatpush.msra.mxu3 %v278_v3 }
  0x8c   :  { %v67_v16 = vpop.f32.mrf.mxu0 }
  0x8d   :  { %v68_v17 = vadd.f32 %v545_v15, %v67_v16 }
  0x90   :  { %v108_v18 = vpop.f32.mrf.mxu1  ;;  %v165_v21 = vpop.f32.mrf.mxu3 }
  0x91   :  { %v138_v19 = vpop.f32.mrf.mxu2  ;;  %v109_v20 = vadd.f32 %v108_v18, %v68_v17 }
  0x93   :  { %v139_v23 = vadd.f32 %v138_v19, %v109_v20 }
  0x94   :  { %v198_v24 = vpop.f32.mrf.mxu0 }
  0x95   :  { %v166_v25 = vadd.f32 %v165_v21, %v139_v23 }
  0x97   :  { %v199_v27 = vadd.f32 %v198_v24, %v166_v25 }
  0x98   :  { %v223_v28 = vpop.f32.mrf.mxu1 }
  0x99   :  { %v224_v29 = vadd.f32 %v223_v28, %v199_v27 }
  0x9b   :  { %vm229_vm2 = vcmp.ge.f32.partialorder %v224_v29, 0.0  ;;  %v230_v31 = vmul.f32 0.2, %v224_v29  ;;  %v226_v32 = vpack.c.bf16 %v224_v29, %v224_v29 }
  0x9d   :  { %v231_v33 = vsel %vm229_vm2, %v224_v29, %v230_v31  ;;  %228 = vst.msk [vmem:[#allocation4] sm:$0xf] %vm227_vm1, %v226_v32 }
  0x9e   :  { %v236_v34 = vmul.f32 1.25, %v231_v33  ;;  %516 = dma.vmem_to_hbm [thread:$0]  %s512_s5, 64, %s514_s12, [#allocation5]  }
  0xa0   :  { %v237_v35 = vsel %vm235_vm3, %v236_v34, 0.0 }
  0xa1   :  { %v254_v36 = vsel %vm252_vm4, %v237_v35, 0  ;;  %v238_v37 = vpack.c.bf16 %v237_v35, %v237_v35 }
  0xa2   :  { %v280_v38 = vand.u32 4294901760, %v254_v36 }
  0xa3   :  { %239 = vst.msk [vmem:[#allocation6] sm:$0xf] %vm227_vm1, %v238_v37 }
  0xa4   :  { %346 = vmatmul.f32.vlgmr.msrb.gmra.mxu3 %v280_v38  ;;  %v281_v39 = vsub.f32 %v254_v36, %v280_v38  ;;  %527 = dma.vmem_to_hbm [thread:$0]  %s523_s14, 64, %s525_s15, [#allocation5]  }
  0xa6   :  { %384 = vmatmul.f32.vlgmr.msra.gmra.mxu0 %v281_v39  ;;  %v282_v40 = vand.u32 4294901760, %v281_v39 }
  0xa8   :  { %415 = vmatmul.f32.vlgmr.msra.gmra.mxu1 %v282_v40  ;;  %v283_v41 = vsub.f32 %v281_v39, %v282_v40 }
  0xaa   :  { %v284_v42 = vand.u32 4294901760, %v283_v41 }
  0xac   :  { %285 = vmatmul.f32.vlgmr.msrb.gmra.mxu2 %v284_v42  ;;  %489 = vmatmul.f32.vlgmr.msra.gmra.mxu3 %v280_v38 }
  0xb4   :  { %460 = vmatmul.f32.vlgmr.msra.gmra.mxu2 %v280_v38 }
 0x123   :  { %v385_v48 = vpop.f32.mrf.mxu0 }
 0x125   :  { %v416_v50 = vpop.f32.mrf.mxu1 }
 0x127   :  { %v347_v44 = vpop.f32.mrf.mxu3 }
 0x12f   :  { %v286_v45 = vpop.f32.mrf.mxu2  ;;  %v490_v54 = vpop.f32.mrf.mxu3 }
 0x130   :  { %v287_v46 = vadd.f32 %v546_v43, %v286_v45 }
 0x132   :  { %v348_v47 = vadd.f32 %v347_v44, %v287_v46 }
 0x134   :  { %v386_v49 = vadd.f32 %v385_v48, %v348_v47 }
 0x136   :  { %v417_v51 = vadd.f32 %v416_v50, %v386_v49 }
 0x137   :  { %v461_v52 = vpop.f32.mrf.mxu2 }
 0x138   :  { %v462_v53 = vadd.f32 %v461_v52, %v417_v51 }
 0x13a   :  { %v491_v55 = vadd.f32 %v490_v54, %v462_v53 }
 0x13c   :  { %494 = vst.msk [vmem:[#allocation2] sm:$0xff] %vm493_vm5, %v491_v55 }
 0x13d   :  { %505 = dma.vmem_to_hbm [thread:$0]  %s501_s18, 128, %s503_s20, [#allocation3]  }
 0x13e   :  { %619 = dma.done.wait [#allocation3], 128  }
 0x13f   :  { %620 = vsyncadd [#allocation3], 4294967168 }
 0x140   :  { %621 = dma.done.wait [#allocation5], 128  }
 0x141   :  { %622 = vsyncadd [#allocation5], 4294967168 }
 0x142   :  { %540 = vsyncpa [#allocation3], 1 }
 0x143   :  { %541 = vsyncpa [#allocation5], 1 }

</bundles_post_ra>
